<compile_context>
chip_gen: v5e
topology: v5e:2x2
jax: 0.10.0
libtpu: 0.0.40
codegen_flags: <defaults>
</compile_context>

<pallas_src>
import jax
import jax.numpy as jnp
from jax.experimental import pallas as pl
from jax.experimental.pallas import tpu as pltpu

EPS = 1e-5


def _upsample_block_kernel(xcol_ref, w_ref, b_ref, g_ref, bt_ref, o_ref):
    """One channel-tile of ConvTranspose1d -> BatchNorm1d(train) -> ReLU.

    xcol_ref : (N*Lout, Cin*K)   output-side im2col of x (resident across grid)
    w_ref    : (Cin*K, c_tile)   compact ConvTranspose1d weight columns
    b_ref    : (1, c_tile)       conv bias
    g_ref    : (1, c_tile)       BN gamma
    bt_ref   : (1, c_tile)       BN beta
    o_ref    : (N, c_tile, Lout) output tile, NCL layout
    """
    n_batch, c_tile, l_out = o_ref.shape

    # ConvTranspose1d as a single MXU matmul with M = N*Lout rows.
    y = jnp.dot(xcol_ref[...], w_ref[...], preferred_element_type=jnp.float32)
    y = y + b_ref[...]                                    # (N*Lout, c_tile), f32

    # BatchNorm1d training-mode batch statistics: per channel over N and L,
    # single reduction pass (sum + sum of squares along the row axis).
    inv_count = 1.0 / float(n_batch * l_out)
    s = jnp.sum(y, axis=0, keepdims=True)                 # (1, c_tile)
    ss = jnp.sum(y * y, axis=0, keepdims=True)            # (1, c_tile)
    mean = s * inv_count
    var = ss * inv_count - mean * mean                    # biased variance
    y_hat = (y - mean) * jax.lax.rsqrt(var + EPS)
    out_nlc = jnp.maximum(y_hat * g_ref[...] + bt_ref[...], 0.0)   # (N*Lout, c_tile)

    # Write NCL directly: per-batch minor transpose (Lout, c_tile)->(c_tile, Lout).
    # VMEM-local XLU work; avoids an extra HBM round-trip for a wrapper transpose.
    for n in range(n_batch):
        blk = out_nlc[n * l_out:(n + 1) * l_out, :]       # (Lout, c_tile)
        o_ref[n] = blk.T.astype(o_ref.dtype)              # (c_tile, Lout)


def _im2col_convT(x, l_out, k_size, stride, padding):
    """Output-side im2col for ConvTranspose1d.

    x: (N, Cin, Lin) -> (N*Lout, Cin*K); zero where no input tap contributes.
    out[n, co, lo] = sum_{ci,k} X_col[n*Lout+lo, ci*K+k] * W[ci, co, k]
    with li = (lo + padding - k) / stride when integral and in range.
    """
    n_b, c_in, l_in = x.shape
    lo = jnp.arange(l_out)
    k = jnp.arange(k_size)
    t = lo[:, None] + padding - k[None, :]                # (Lout, K)
    li = t // stride
    valid = (t % stride == 0) & (li >= 0) & (li < l_in)
    li_c = jnp.clip(li, 0, l_in - 1)
    xg = x[:, :, li_c]                                    # (N, Cin, Lout, K)
    xg = jnp.where(valid[None, None, :, :], xg, 0.0)
    # -> (N, Lout, Cin, K) -> (N*Lout, Cin*K)
    return jnp.transpose(xg, (0, 2, 1, 3)).reshape(n_b * l_out, c_in * k_size)


def upsample1d_block(x, weight, bias, gamma, beta, *,
                     stride, padding, output_padding=0, use_bf16=False):
    """x: (N, Cin, Lin) f32. weight: (Cin, Cout, K) (nn.ConvTranspose1d layout).
    Returns (N, Cout, Lout) f32 in NCL layout."""
    n_b, c_in, l_in = x.shape
    _, c_out, k_size = weight.shape
    l_out = (l_in - 1) * stride - 2 * padding + k_size + output_padding

    # Compact weight: (Cin*K, Cout)  -- W2[ci*K + k, co] = weight[ci, co, k].
    w2 = jnp.transpose(weight, (0, 2, 1)).reshape(c_in * k_size, c_out)
    x_col = _im2col_convT(x.astype(jnp.float32), l_out, k_size, stride, padding)

    if use_bf16:   # v6e/v7x: bf16-native MXU, f32 accumulate; epilogue stays f32.
        x_col = x_col.astype(jnp.bfloat16)
        w2 = w2.astype(jnp.bfloat16)

    # Channel tiling; c_tile must equal Cout or be a multiple of 128 (lane rule).
    c_tile = 128 if (c_out > 128 and c_out % 128 == 0) else c_out
    n_ct = c_out // c_tile

    b2 = bias.reshape(1, c_out).astype(jnp.float32)
    g2 = gamma.reshape(1, c_out).astype(jnp.float32)
    bt2 = beta.reshape(1, c_out).astype(jnp.float32)

    m_rows = n_b * l_out
    cin_k = c_in * k_size
    in_bytes = 2 if use_bf16 else 4
    est_vmem = (2 * m_rows * cin_k * in_bytes      # resident x_col (double-buffered)
                + 2 * cin_k * c_tile * in_bytes    # weight tile
                + 2 * n_b * c_tile * l_out * 4     # output tile
                + 4 * m_rows * c_tile * 4)         # f32 temporaries
    vmem_limit = None
    if est_vmem > 32 * 1024 * 1024:
        vmem_limit = int(min(est_vmem * 1.25, 100 * 1024 * 1024))

    out = pl.pallas_call(
        _upsample_block_kernel,
        out_shape=jax.ShapeDtypeStruct((n_b, c_out, l_out), jnp.float32),
        grid=(n_ct,),
        in_specs=[
            pl.BlockSpec((m_rows, cin_k), lambda c: (0, 0)),     # im2col (resident)
            pl.BlockSpec((cin_k, c_tile), lambda c: (0, c)),     # weight columns
            pl.BlockSpec((1, c_tile), lambda c: (0, c)),         # bias
            pl.BlockSpec((1, c_tile), lambda c: (0, c)),         # gamma
            pl.BlockSpec((1, c_tile), lambda c: (0, c)),         # beta
        ],
        out_specs=pl.BlockSpec((n_b, c_tile, l_out), lambda c: (0, c, 0)),
        compiler_params=pltpu.CompilerParams(
            dimension_semantics=("parallel",),
            vmem_limit_bytes=vmem_limit,
        ),
    )(x_col, w2, b2, g2, bt2)
    return out


def _reference(x, weight, bias, gamma, beta, stride, padding, output_padding):
    """Pure-JAX reference: ConvTranspose1d + BatchNorm1d(train) + ReLU."""
    n_b, c_in, l_in = x.shape
    _, c_out, k_size = weight.shape
    l_out = (l_in - 1) * stride - 2 * padding + k_size + output_padding
    contrib = jnp.einsum('ncl,cok->nolk', x, weight)      # (N, Cout, Lin, K)
    full_len = (l_in - 1) * stride + k_size + output_padding
    out_full = jnp.zeros((n_b, c_out, full_len), jnp.float32)
    for li in range(l_in):
        out_full = out_full.at[:, :, li * stride: li * stride + k_size].add(contrib[:, :, li, :])
    y = out_full[:, :, padding: padding + l_out] + bias[None, :, None]
    mean = jnp.mean(y, axis=(0, 2), keepdims=True)
    var = jnp.mean(jnp.square(y - mean), axis=(0, 2), keepdims=True)
    y_hat = (y - mean) * jax.lax.rsqrt(var + EPS)
    return jnp.maximum(y_hat * gamma[None, :, None] + beta[None, :, None], 0.0)


def _run_case(key, n_b, c_in, c_out, l_in, k_size, stride, padding, output_padding):
    kx, kw, kb, kg, kbt = jax.random.split(key, 5)
    x = jax.random.normal(kx, (n_b, c_in, l_in), jnp.float32)
    weight = jax.random.normal(kw, (c_in, c_out, k_size), jnp.float32) * 0.2
    bias = jax.random.normal(kb, (c_out,), jnp.float32) * 0.1
    gamma = jnp.ones((c_out,), jnp.float32) + 0.1 * jax.random.normal(kg, (c_out,), jnp.float32)
    beta = 0.1 * jax.random.normal(kbt, (c_out,), jnp.float32)

    out = upsample1d_block(x, weight, bias, gamma, beta,
                           stride=stride, padding=padding,
                           output_padding=output_padding)
    out = jax.block_until_ready(out)

    ref = _reference(x, weight, bias, gamma, beta, stride, padding, output_padding)
    l_out = (l_in - 1) * stride - 2 * padding + k_size + output_padding
    assert out.shape == ref.shape == (n_b, c_out, l_out)
    err = float(jnp.max(jnp.abs(out - ref)))
    assert jnp.allclose(out, ref, atol=1e-4, rtol=1e-4), err


if __name__ == "__main__":
    key = jax.random.PRNGKey(0)
    k1, k2 = jax.random.split(key)
    # ConvTranspose1d(4 -> 8, K=4, stride=2, padding=1)
    _run_case(k1, n_b=2, c_in=4, c_out=8, l_in=16,
              k_size=4, stride=2, padding=1, output_padding=0)
    # ConvTranspose1d(8 -> 16, K=5, stride=3, padding=2, output_padding=1)
    _run_case(k2, n_b=2, c_in=8, c_out=16, l_in=16,
              k_size=5, stride=3, padding=2, output_padding=1)
    print("KERNEL_OK")
</pallas_src>

<mosaic_0001>
module attributes {stable_mosaic.version = 11 : i64} {
  func.func @_upsample_block_kernel(%arg0: i32, %arg1: memref<64x16xf32, #tpu.memory_space<vmem>>, %arg2: memref<16x8xf32, #tpu.memory_space<vmem>>, %arg3: memref<1x8xf32, #tpu.memory_space<vmem>>, %arg4: memref<1x8xf32, #tpu.memory_space<vmem>>, %arg5: memref<1x8xf32, #tpu.memory_space<vmem>>, %arg6: memref<2x8x32xf32, #tpu.memory_space<vmem>>) attributes {dimension_semantics = [#tpu.dimension_semantics<parallel>], iteration_bounds = array<i64: 1>, scalar_prefetch = 0 : i64, scratch_operands = 0 : i64, tpu.core_type = #tpu.core_type<tc>, window_params = [{pipeline_mode = #tpu.pipeline_mode<synchronous>, transform_indices = @transform_0, window_bounds = array<i64: 64, 16>}, {transform_indices = @transform_1, window_bounds = array<i64: 16, 8>}, {transform_indices = @transform_2, window_bounds = array<i64: 1, 8>}, {transform_indices = @transform_3, window_bounds = array<i64: 1, 8>}, {transform_indices = @transform_4, window_bounds = array<i64: 1, 8>}, {transform_indices = @transform_5, window_bounds = array<i64: 2, 8, 32>}]} {
    %c0 = arith.constant 0 : index
    %c0_0 = arith.constant 0 : index
    %0 = vector.load %arg1[%c0, %c0_0] : memref<64x16xf32, #tpu.memory_space<vmem>>, vector<64x16xf32>
    %c0_1 = arith.constant 0 : index
    %c0_2 = arith.constant 0 : index
    %1 = vector.load %arg2[%c0_1, %c0_2] : memref<16x8xf32, #tpu.memory_space<vmem>>, vector<16x8xf32>
    %cst = arith.constant dense<0.000000e+00> : vector<64x8xf32>
    %2 = tpu.matmul %0, %1, %cst {dimension_numbers = #tpu.dot_dimension_numbers<[1], [0], [0], [1], [0, 0, 1, 1], [], []>} : vector<64x16xf32>, vector<16x8xf32>, vector<64x8xf32> -> vector<64x8xf32>
    %c0_3 = arith.constant 0 : index
    %c0_4 = arith.constant 0 : index
    %3 = vector.load %arg3[%c0_3, %c0_4] : memref<1x8xf32, #tpu.memory_space<vmem>>, vector<1x8xf32>
    %4 = vector.broadcast %3 : vector<1x8xf32> to vector<64x8xf32>
    %5 = arith.addf %2, %4 : vector<64x8xf32>
    %cst_5 = arith.constant dense<0.000000e+00> : vector<8xf32>
    %6 = vector.multi_reduction <add>, %5, %cst_5 [0] : vector<64x8xf32> to vector<8xf32>
    %7 = vector.shape_cast %6 : vector<8xf32> to vector<1x8xf32>
    %8 = arith.mulf %5, %5 : vector<64x8xf32>
    %cst_6 = arith.constant dense<0.000000e+00> : vector<8xf32>
    %9 = vector.multi_reduction <add>, %8, %cst_6 [0] : vector<64x8xf32> to vector<8xf32>
    %10 = vector.shape_cast %9 : vector<8xf32> to vector<1x8xf32>
    %cst_7 = arith.constant 1.562500e-02 : f32
    %11 = vector.broadcast %cst_7 : f32 to vector<1x8xf32>
    %12 = arith.mulf %7, %11 : vector<1x8xf32>
    %cst_8 = arith.constant 1.562500e-02 : f32
    %13 = vector.broadcast %cst_8 : f32 to vector<1x8xf32>
    %14 = arith.mulf %10, %13 : vector<1x8xf32>
    %15 = arith.mulf %12, %12 : vector<1x8xf32>
    %16 = arith.subf %14, %15 : vector<1x8xf32>
    %17 = vector.broadcast %12 : vector<1x8xf32> to vector<64x8xf32>
    %18 = arith.subf %5, %17 : vector<64x8xf32>
    %cst_9 = arith.constant 9.99999974E-6 : f32
    %19 = vector.broadcast %cst_9 : f32 to vector<1x8xf32>
    %20 = arith.addf %16, %19 : vector<1x8xf32>
    %21 = math.rsqrt %20 : vector<1x8xf32>
    %22 = vector.broadcast %21 : vector<1x8xf32> to vector<64x8xf32>
    %23 = arith.mulf %18, %22 : vector<64x8xf32>
    %c0_10 = arith.constant 0 : index
    %c0_11 = arith.constant 0 : index
    %24 = vector.load %arg4[%c0_10, %c0_11] : memref<1x8xf32, #tpu.memory_space<vmem>>, vector<1x8xf32>
    %25 = vector.broadcast %24 : vector<1x8xf32> to vector<64x8xf32>
    %26 = arith.mulf %23, %25 : vector<64x8xf32>
    %c0_12 = arith.constant 0 : index
    %c0_13 = arith.constant 0 : index
    %27 = vector.load %arg5[%c0_12, %c0_13] : memref<1x8xf32, #tpu.memory_space<vmem>>, vector<1x8xf32>
    %28 = vector.broadcast %27 : vector<1x8xf32> to vector<64x8xf32>
    %29 = arith.addf %26, %28 : vector<64x8xf32>
    %cst_14 = arith.constant 0.000000e+00 : f32
    %30 = vector.broadcast %cst_14 : f32 to vector<64x8xf32>
    %31 = arith.maximumf %29, %30 : vector<64x8xf32>
    %32 = vector.extract_strided_slice %31 {offsets = [0, 0], sizes = [32, 8], strides = [1, 1]} : vector<64x8xf32> to vector<32x8xf32>
    %33 = tpu.transpose %32, [1, 0] : vector<32x8xf32> -> vector<8x32xf32>
    %c0_15 = arith.constant 0 : index
    %c0_16 = arith.constant 0 : index
    %c0_17 = arith.constant 0 : index
    %34 = vector.load %arg6[%c0_15, %c0_16, %c0_17] : memref<2x8x32xf32, #tpu.memory_space<vmem>>, vector<1x8x32xf32>
    %35 = vector.shape_cast %34 : vector<1x8x32xf32> to vector<8x32xf32>
    %36 = vector.shape_cast %33 : vector<8x32xf32> to vector<1x8x32xf32>
    tpu.vector_store %arg6[%c0_15, %c0_16, %c0_17], %36 {strides = array<i32>} : memref<2x8x32xf32, #tpu.memory_space<vmem>>, vector<1x8x32xf32>,
    %37 = vector.extract_strided_slice %31 {offsets = [32, 0], sizes = [32, 8], strides = [1, 1]} : vector<64x8xf32> to vector<32x8xf32>
    %38 = tpu.transpose %37, [1, 0] : vector<32x8xf32> -> vector<8x32xf32>
    %c1 = arith.constant 1 : index
    %c0_18 = arith.constant 0 : index
    %c0_19 = arith.constant 0 : index
    %39 = vector.load %arg6[%c1, %c0_18, %c0_19] : memref<2x8x32xf32, #tpu.memory_space<vmem>>, vector<1x8x32xf32>
    %40 = vector.shape_cast %39 : vector<1x8x32xf32> to vector<8x32xf32>
    %41 = vector.shape_cast %38 : vector<8x32xf32> to vector<1x8x32xf32>
    tpu.vector_store %arg6[%c1, %c0_18, %c0_19], %41 {strides = array<i32>} : memref<2x8x32xf32, #tpu.memory_space<vmem>>, vector<1x8x32xf32>,
    return
  }
  func.func @transform_0(%arg0: i32) -> (i32, i32) {
    %c0_i32 = arith.constant 0 : i32
    %c0_i32_0 = arith.constant 0 : i32
    %c0_i32_1 = arith.constant 0 : i32
    return %c0_i32, %c0_i32_0 : i32, i32
  }
  func.func @transform_1(%arg0: i32) -> (i32, i32) {
    %c0_i32 = arith.constant 0 : i32
    %c0_i32_0 = arith.constant 0 : i32
    return %c0_i32, %arg0 : i32, i32
  }
  func.func @transform_2(%arg0: i32) -> (i32, i32) {
    %c0_i32 = arith.constant 0 : i32
    %c0_i32_0 = arith.constant 0 : i32
    return %c0_i32, %arg0 : i32, i32
  }
  func.func @transform_3(%arg0: i32) -> (i32, i32) {
    %c0_i32 = arith.constant 0 : i32
    %c0_i32_0 = arith.constant 0 : i32
    return %c0_i32, %arg0 : i32, i32
  }
  func.func @transform_4(%arg0: i32) -> (i32, i32) {
    %c0_i32 = arith.constant 0 : i32
    %c0_i32_0 = arith.constant 0 : i32
    return %c0_i32, %arg0 : i32, i32
  }
  func.func @transform_5(%arg0: i32) -> (i32, i32, i32) {
    %c0_i32 = arith.constant 0 : i32
    %c0_i32_0 = arith.constant 0 : i32
    %c0_i32_1 = arith.constant 0 : i32
    return %c0_i32, %arg0, %c0_i32_0 : i32, i32, i32
  }
}

</mosaic_0001>

<bundles_post_ra>
// kernel: tpu_custom_call.1
= control target key start
LH: loop header
LB: loop body
LE: loop exit
PB: predicated region body
PF: predicated region fallthrough
CT: control target
= control target key end

     0   :  { %vm35_vm0 = vcmask 130048   ;;  %s497_s0 = inlined_call_operand.vmem [shape: f32[64,16], index: 0, kind: input, shape index: {}]   ;;  %s498_s1 = inlined_call_operand.vmem [shape: f32[16,8], index: 1, kind: input, shape index: {}]   ;;  %s499_s2 = inlined_call_operand.vmem [shape: f32[1,8], index: 2, kind: input, shape index: {}]   ;;  %s500_s3 = inlined_call_operand.vmem [shape: f32[1,8], index: 3, kind: input, shape index: {}]   ;;  %s501_s4 = inlined_call_operand.vmem [shape: f32[1,8], index: 4, kind: input, shape index: {}]   ;;  %s502_s5 = inlined_call_operand.hbm [shape: f32[2,8,32], index: 5, kind: output, shape index: {}]  }
   0x1   :  { %v30_v0 = vld [vmem:[%s498_s1 + $0x8] sm:$0xff]  ;;  %v29_v1 = vld [vmem:[%s498_s1] sm:$0xff]  ;;  %v23_v4 = vld [vmem:[%s497_s0 + $0x10] sm:$0xff] }
   0x2   :  { %74 = vmatpush.msra.mxu0 %v30_v0  ;;  %310 = vmatpush.msra.mxu2 %v30_v0  ;;  %v21_v2 = vld [vmem:[%s497_s0] sm:$0xff]  ;;  %v27_v5 = vld [vmem:[%s497_s0 + $0x30] sm:$0xff] }
   0x3   :  { %v25_v3 = vld [vmem:[%s497_s0 + $0x20] sm:$0xff]  ;;  %309 = vmatpush.msra.mxu1 %v30_v0  ;;  %311 = vmatpush.msra.mxu3 %v30_v0 }
   0x4   :  { %75 = vmatpush.msra.mxu0 %v29_v1  ;;  %313 = vmatpush.msra.mxu2 %v29_v1 }
   0x5   :  { %301 = vmatmul.msk.f32.vlgmr.msra.gmra.mxu0 %vm35_vm0, %v21_v2  ;;  %305 = vmatmul.msk.f32.vlgmr.msra.gmra.mxu2 %vm35_vm0, %v25_v3 }
   0x6   :  { %10 = vsyncpa [#allocation3], 0  ;;  %312 = vmatpush.msra.mxu1 %v29_v1  ;;  %314 = vmatpush.msra.mxu3 %v29_v1  ;;  %v22_v6 = vld [vmem:[%s497_s0 + $0x8] sm:$0xff]  ;;  %v24_v8 = vld [vmem:[%s497_s0 + $0x18] sm:$0xff]  ;;  %vm101_vm1 = vcmask 64512   ;;  %s289_s18 = sshll.u32 %s502_s5, 4  ;;  %s290_s18 = int_to_ptr.hbm [resolvable:$true] %s289_s18 }
   0x7   :  { %303 = vmatmul.msk.f32.vlgmr.msra.gmra.mxu1 %vm35_vm0, %v23_v4  ;;  %307 = vmatmul.msk.f32.vlgmr.msra.gmra.mxu3 %vm35_vm0, %v27_v5  ;;  %v26_v7 = vld [vmem:[%s497_s0 + $0x28] sm:$0xff]  ;;  %v28_v9 = vld [vmem:[%s497_s0 + $0x38] sm:$0xff]  ;;  %v319_v10 = vld [vmem:[%s499_s2] ss:$0 sm:$0xff]  ;;  %vm247_vm5 = vcmask 261120   ;;  %s351_s19 = smov 128  }
   0x8   :  { %s352_s20 = smov 8  }
   0xd   :  { %302 = vmatmul.msk.f32.gmra.mxu0 %vm35_vm0, %v22_v6  ;;  %306 = vmatmul.msk.f32.gmra.mxu2 %vm35_vm0, %v26_v7 }
   0xf   :  { %304 = vmatmul.msk.f32.gmra.mxu1 %vm35_vm0, %v24_v8  ;;  %308 = vmatmul.msk.f32.gmra.mxu3 %vm35_vm0, %v28_v9 }
  0x82   :  { %v77_v11 = vpop.f32.mrf.mxu0 }
  0x83   :  { %v424_v13 = vadd.f32 %v319_v10, %v77_v11 }
  0x84   :  { %v83_v12 = vpop.f32.mrf.mxu1 }
  0x85   :  { %v426_v14 = vadd.f32 %v319_v10, %v83_v12  ;;  %v123_v16 = vmul.f32 %v424_v13, %v424_v13  ;;  %v102_v20 = vsel %vm101_vm1, %v424_v13, 0.0 }
  0x87   :  { %v125_v21 = vmul.f32 %v426_v14, %v426_v14  ;;  %v131_v27 = vsel %vm101_vm1, %v123_v16, 0.0  ;;  %v105_v29 = vsel %vm101_vm1, %v426_v14, 0.0 }
  0x88   :  { %v89_v15 = vpop.f32.mrf.mxu2 }
  0x89   :  { %v440_v25 = vadd.f32 %v319_v10, %v89_v15  ;;  %v134_v33 = vsel %vm101_vm1, %v125_v21, 0.0 }
  0x8a   :  { %v80_v17 = vpop.f32.mrf.mxu0  ;;  %v95_v18 = vpop.f32.mrf.mxu3 }
  0x8b   :  { %v430_v19 = vadd.f32 %v319_v10, %v80_v17  ;;  %v127_v37 = vmul.f32 %v440_v25, %v440_v25  ;;  %v456_v39 = vadd.f32 %v319_v10, %v95_v18  ;;  %v109_v44 = vsel %vm101_vm1, %v440_v25, 0.0 }
  0x8c   :  { %v86_v22 = vpop.f32.mrf.mxu1 }
  0x8d   :  { %v103_v23 = vsel %vm101_vm1, %v430_v19, 0.0  ;;  %v124_v24 = vmul.f32 %v430_v19, %v430_v19  ;;  %v442_v26 = vadd.f32 %v319_v10, %v86_v22  ;;  %v138_v50 = vsel %vm101_vm1, %v127_v37, 0.0 }
  0x8e   :  { %v104_v28 = vadd.f32 %v103_v23, %v102_v20  ;;  %v129_v51 = vmul.f32 %v456_v39, %v456_v39  ;;  %v113_v56 = vsel %vm101_vm1, %v456_v39, 0.0 }
  0x8f   :  { %v132_v30 = vsel %vm101_vm1, %v124_v24, 0.0  ;;  %v107_v31 = vsel %vm101_vm1, %v442_v26, 0.0  ;;  %v126_v32 = vmul.f32 %v442_v26, %v442_v26 }
  0x90   :  { %v133_v34 = vadd.f32 %v132_v30, %v131_v27  ;;  %v106_v35 = vadd.f32 %v105_v29, %v104_v28  ;;  %v92_v36 = vpop.f32.mrf.mxu2  ;;  %v142_v60 = vsel %vm101_vm1, %v129_v51, 0.0  ;;  %v320_v30 = vld [vmem:[%s500_s3] ss:$0 sm:$0xff]  ;;  %s350_s3 = smov [#allocation2]  }
  0x91   :  { %v136_v38 = vsel %vm101_vm1, %v126_v32, 0.0  ;;  %v458_v40 = vadd.f32 %v319_v10, %v92_v36 }
  0x92   :  { %v108_v41 = vadd.f32 %v107_v31, %v106_v35  ;;  %v135_v42 = vadd.f32 %v134_v33, %v133_v34  ;;  %v98_v43 = vpop.f32.mrf.mxu3  ;;  %v321_v34 = vld [vmem:[%s501_s4] ss:$0 sm:$0xff]  ;;  %s287_s4 = sshll.u32 %s350_s3, 4  ;;  %s288_s4 = int_to_ptr.vmem [resolvable:$true] %s287_s4 }
  0x93   :  { %v111_v45 = vsel %vm101_vm1, %v458_v40, 0.0  ;;  %v128_v46 = vmul.f32 %v458_v40, %v458_v40  ;;  %v466_v47 = vadd.f32 %v319_v10, %v98_v43 }
  0x94   :  { %v137_v48 = vadd.f32 %v136_v38, %v135_v42  ;;  %v110_v49 = vadd.f32 %v109_v44, %v108_v41 }
  0x95   :  { %v140_v52 = vsel %vm101_vm1, %v128_v46, 0.0  ;;  %v130_v53 = vmul.f32 %v466_v47, %v466_v47  ;;  %v115_v57 = vsel %vm101_vm1, %v466_v47, 0.0 }
  0x96   :  { %v112_v54 = vadd.f32 %v111_v45, %v110_v49  ;;  %v139_v55 = vadd.f32 %v138_v50, %v137_v48 }
  0x97   :  { %v144_v61 = vsel %vm101_vm1, %v130_v53, 0.0 }
  0x98   :  { %v141_v58 = vadd.f32 %v140_v52, %v139_v55  ;;  %v114_v59 = vadd.f32 %v113_v56, %v112_v54 }
  0x9a   :  { %v116_v62 = vadd.f32 %v115_v57, %v114_v59  ;;  %v143_v63 = vadd.f32 %v142_v60, %v141_v58 }
  0x9c   :  { %v117_v0 = vrot.slane %v116_v62, 4  ;;  %v145_v1 = vadd.f32 %v144_v61, %v143_v63 }
  0x9e   :  { %v118_v2 = vadd.f32 %v117_v0, %v116_v62  ;;  %v146_v3 = vrot.slane %v145_v1, 4 }
  0xa0   :  { %v119_v4 = vrot.slane %v118_v2, 2  ;;  %v147_v5 = vadd.f32 %v146_v3, %v145_v1 }
  0xa2   :  { %v120_v6 = vadd.f32 %v119_v4, %v118_v2  ;;  %v148_v7 = vrot.slane %v147_v5, 2 }
  0xa4   :  { %v121_v8 = vrot.slane %v120_v6, 1  ;;  %v149_v9 = vadd.f32 %v148_v7, %v147_v5 }
  0xa6   :  { %v122_v10 = vadd.f32 %v121_v8, %v120_v6  ;;  %v150_v11 = vrot.slane %v149_v9, 1 }
  0xa8   :  { %v151_v12 = vadd.f32 %v150_v11, %v149_v9  ;;  %v152_v15 = vmul.f32 0.015625, %v122_v10 }
  0xaa   :  { %v153_v16 = vmul.f32 0.015625, %v151_v12  ;;  %v154_v17 = vmul.f32 %v152_v15, %v152_v15  ;;  %v160_v29 = vsub.f32 %v440_v25, %v152_v15  ;;  %v156_v31 = vsub.f32 %v424_v13, %v152_v15 }
  0xab   :  { %v161_v36 = vsub.f32 %v458_v40, %v152_v15  ;;  %v157_v37 = vsub.f32 %v430_v19, %v152_v15  ;;  %v162_v49 = vsub.f32 %v456_v39, %v152_v15  ;;  %v158_v50 = vsub.f32 %v426_v14, %v152_v15 }
  0xac   :  { %v155_v18 = vsub.f32 %v153_v16, %v154_v17  ;;  %v163_v57 = vsub.f32 %v466_v47, %v152_v15  ;;  %v159_v58 = vsub.f32 %v442_v26, %v152_v15 }
  0xae   :  { %v164_v20 = vadd.f32 1e-05, %v155_v18 }
  0xb0   :  { %322 = vrsqrt.f32 %v164_v20  ;;  %vm171_vm3 = vweird.f32 %v164_v20 }
  0xb6   :  { %v323_v21 = vpop.eup %322 }
  0xb7   :  { %v166_v22 = vmul.f32 %v323_v21, %v164_v20  ;;  %vm172_vm2 = vweird.f32 %v323_v21 }
  0xb8   :  { %vm173_vm4 = vmor %vm171_vm3, %vm172_vm2 }
  0xb9   :  { %v167_v23 = vmul.f32 %v323_v21, %v166_v22 }
  0xbb   :  { %v168_v24 = vmul.f32 0.5, %v167_v23 }
  0xbd   :  { %v169_v27 = vsub.f32 1.5, %v168_v24 }
  0xbf   :  { %v170_v28 = vmul.f32 %v323_v21, %v169_v27 }
  0xc1   :  { %v174_v32 = vsel %vm173_vm4, %v323_v21, %v170_v28 }
  0xc2   :  { %v179_v33 = vmul.f32 %v174_v32, %v160_v29  ;;  %v175_v35 = vmul.f32 %v174_v32, %v156_v31  ;;  %v180_v25 = vmul.f32 %v174_v32, %v161_v36  ;;  %v176_v42 = vmul.f32 %v174_v32, %v157_v37 }
  0xc3   :  { %v181_v52 = vmul.f32 %v174_v32, %v162_v49  ;;  %v177_v19 = vmul.f32 %v174_v32, %v158_v50  ;;  %v182_v61 = vmul.f32 %v174_v32, %v163_v57  ;;  %v178_v39 = vmul.f32 %v174_v32, %v159_v58 }
  0xc4   :  { %v191_v38 = vmul.f32 %v320_v30, %v179_v33  ;;  %v187_v41 = vmul.f32 %v320_v30, %v175_v35  ;;  %v192_v13 = vmul.f32 %v320_v30, %v180_v25  ;;  %v188_v48 = vmul.f32 %v320_v30, %v176_v42 }
  0xc5   :  { %v193_v55 = vmul.f32 %v320_v30, %v181_v52  ;;  %v189_v56 = vmul.f32 %v320_v30, %v177_v19  ;;  %v194_v63 = vmul.f32 %v320_v30, %v182_v61  ;;  %v190_v0 = vmul.f32 %v320_v30, %v178_v39 }
  0xc6   :  { %v203_v43 = vadd.f32 %v321_v34, %v191_v38  ;;  %v199_v44 = vadd.f32 %v321_v34, %v187_v41  ;;  %v204_v51 = vadd.f32 %v321_v34, %v192_v13  ;;  %v200_v40 = vadd.f32 %v321_v34, %v188_v48 }
  0xc7   :  { %v205_v59 = vadd.f32 %v321_v34, %v193_v55  ;;  %v201_v60 = vadd.f32 %v321_v34, %v189_v56  ;;  %v206_v1 = vadd.f32 %v321_v34, %v194_v63  ;;  %v202_v2 = vadd.f32 %v321_v34, %v190_v0 }
  0xc8   :  { %v211_v45 = vmax.f32 %v203_v43, 0.0  ;;  %v207_v46 = vmax.f32 %v199_v44, 0.0  ;;  %v212_v53 = vmax.f32 %v204_v51, 0.0  ;;  %v208_v54 = vmax.f32 %v200_v40, 0.0 }
  0xc9   :  { %v213_v62 = vmax.f32 %v205_v59, 0.0  ;;  %v209_v14 = vmax.f32 %v201_v60, 0.0  ;;  %v214_v3 = vmax.f32 %v206_v1, 0.0  ;;  %v210_v4 = vmax.f32 %v202_v2, 0.0 }
  0xca   :  { %249 = vxpose.xlu1.b32.start [1/4] (short) (narrow) %v211_v45, 8  ;;  %215 = vxpose.xlu0.b32.start [1/4] (short) (narrow) %v207_v46, 8 }
  0xd2   :  { %250 = vxpose.xlu1.b32.cont [2/4] (short) (narrow) %v212_v53, 8  ;;  %216 = vxpose.xlu0.b32.cont [2/4] (short) (narrow) %v208_v54, 8 }
  0xda   :  { %251 = vxpose.xlu1.b32.cont [3/4] (short) (narrow) %v213_v62, 8  ;;  %217 = vxpose.xlu0.b32.cont [3/4] (short) (narrow) %v209_v14, 8 }
  0xe2   :  { %252 = vxpose.xlu1.b32.end [4/4] (short) (narrow) %v214_v3, 8  ;;  %218 = vxpose.xlu0.b32.end [4/4] (short) (narrow) %v210_v4, 8 }
 0x16e   :  { %v265_v26 = vpop.trf.xlu1  ;;  %v231_v47 = vpop.trf.xlu0 }
 0x16f   :  { %282 = vst.msk [vmem:[#allocation2 + $0x8] sm:$0xff] %vm247_vm5, %v265_v26 }
 0x170   :  { %248 = vst.msk [vmem:[#allocation2] sm:$0xff] %vm247_vm5, %v231_v47 }
 0x171   :  { %295 = dma.vmem_to_hbm [thread:$0]  %s288_s4, 256, %s290_s18, [#allocation3], %s351_s19, %s351_s19, %s352_s20  }
 0x172   :  { %348 = dma.done.wait [#allocation3], 256  }
 0x173   :  { %349 = vsyncadd [#allocation3], 4294967040 }
 0x174   :  { %300 = vsyncpa [#allocation3], 1 }

</bundles_post_ra>
